<compile_context>
chip_gen: v7x
topology: tpu7x:2x2x1
jax: 0.10.0
libtpu: 0.0.40
codegen_flags: <defaults>
</compile_context>

<pallas_src>
import functools

import jax
import jax.numpy as jnp
from jax.experimental import pallas as pl
from jax.experimental.pallas import tpu as pltpu


def _fused_mlp_kernel(*refs, num_layers):
    # refs = (x_ref, w0, b0, w1, b1, ..., w_{L-1}, b_{L-1}, o_ref)
    x_ref, o_ref = refs[0], refs[-1]
    wb_refs = refs[1:-1]
    h = x_ref[...]  # (TB, D0) bfloat16
    for li in range(num_layers):
        w = wb_refs[2 * li][...]       # (Din, Dout) bfloat16
        b = wb_refs[2 * li + 1][...]   # (1, Dout)   float32
        z = jnp.dot(h, w, preferred_element_type=jnp.float32) + b
        # sigmoid(z) - 0.5 == 0.5 * tanh(0.5 * z)  (single EUP transcendental)
        t = 0.5 * jnp.tanh(0.5 * z)
        if li == num_layers - 1:
            o_ref[...] = t                              # already sigmoid - 0.5
        else:
            h = (t + 0.5).astype(jnp.bfloat16)          # sigmoid(z), bf16 for MXU


def _round_up(x, m):
    return (x + m - 1) // m * m


def _x_block_spec(tb, d0):
    # 3-deep input pipelining (input DMA is the bottleneck at large tiles);
    # graceful fallback if this JAX build lacks the pipeline_mode kwarg.
    try:
        return pl.BlockSpec((tb, d0), lambda i: (i, 0),
                            pipeline_mode=pl.Buffered(3))
    except TypeError:
        return pl.BlockSpec((tb, d0), lambda i: (i, 0))


def mlp_forward_fused(x_flat, params, *, batch_tile=1024):
    """Fused MLP forward: sigmoid-chained Linears, final output minus 0.5.

    x_flat : (B, D0) float32/bfloat16
    params : list of (w, b) with w already transposed to (in, out).
    """
    B, d0 = x_flat.shape
    num_layers = len(params)
    d_out = params[-1][0].shape[1]

    # bf16 input & weights; f32 biases; f32 accumulation inside the kernel.
    x_flat = x_flat.astype(jnp.bfloat16)
    flat_wb = []
    for w, b in params:
        flat_wb.append(w.astype(jnp.bfloat16))
        flat_wb.append(b.reshape(1, -1).astype(jnp.float32))

    kernel = functools.partial(_fused_mlp_kernel, num_layers=num_layers)

    b_pad = _round_up(B, 8)

    if b_pad < 128:
        # Small batch: single invocation, no grid machinery, all in VMEM.
        if b_pad != B:
            x_flat = jnp.pad(x_flat, ((0, b_pad - B), (0, 0)))
        vmem = pl.BlockSpec(memory_space=pltpu.MemorySpace.VMEM)
        out = pl.pallas_call(
            kernel,
            out_shape=jax.ShapeDtypeStruct((b_pad, d_out), jnp.float32),
            in_specs=[vmem] * (1 + len(flat_wb)),
            out_specs=vmem,
        )(x_flat, *flat_wb)
    else:
        # Tiled path: big batch tiles (default 1024 rows) to amortize the
        # per-grid-step overhead, but always >= 2 tiles so the "parallel"
        # batch axis can shard across both TensorCores on v7x. Tile rounded
        # to 16 rows (bf16 sublane packing).
        tb = min(batch_tile, _round_up(pl.cdiv(b_pad, 2), 16))
        b_pad = _round_up(b_pad, tb)
        if b_pad != B:
            x_flat = jnp.pad(x_flat, ((0, b_pad - B), (0, 0)))
        num_tiles = b_pad // tb

        in_specs = [_x_block_spec(tb, d0)]
        for w, _ in params:
            din, dout = w.shape
            # Constant index_map -> params DMA'd once, stay VMEM-resident.
            in_specs.append(pl.BlockSpec((din, dout), lambda i: (0, 0)))
            in_specs.append(pl.BlockSpec((1, dout), lambda i: (0, 0)))

        out = pl.pallas_call(
            kernel,
            out_shape=jax.ShapeDtypeStruct((b_pad, d_out), jnp.float32),
            grid=(num_tiles,),
            in_specs=in_specs,
            out_specs=pl.BlockSpec((tb, d_out), lambda i: (i, 0)),
            compiler_params=pltpu.CompilerParams(
                dimension_semantics=("parallel",)
            ),
        )(x_flat, *flat_wb)

    return out[:B]


def neural_network_forward(x, params):
    # nn.Flatten() equivalent (plain JAX glue): keep batch dim, flatten rest.
    B = x.shape[0]
    h = x.reshape(B, -1)
    return mlp_forward_fused(h, params)


def init_params(sizes, key):
    """Deterministic params mimicking nn.Linear init: U(-1/sqrt(fan_in), ...).

    Weights are stored already transposed to (in, out)."""
    params = []
    for i in range(len(sizes) - 1):
        fan_in, fan_out = sizes[i], sizes[i + 1]
        key, kw, kb = jax.random.split(key, 3)
        bound = 1.0 / jnp.sqrt(jnp.float32(fan_in))
        w = jax.random.uniform(kw, (fan_in, fan_out), jnp.float32, -bound, bound)
        b = jax.random.uniform(kb, (fan_out,), jnp.float32, -bound, bound)
        params.append((w, b))
    return params


def _reference_forward(x, params):
    h = x.reshape(x.shape[0], -1).astype(jnp.float32)
    for w, b in params:
        h = jax.nn.sigmoid(h @ w + b)
    return h - 0.5


if __name__ == "__main__":
    # sizes implies flattened input features = sizes[0]
    sizes = [64, 32, 16, 8]
    key = jax.random.PRNGKey(0)
    kx, kp, kx2, kx3 = jax.random.split(key, 4)

    # small input consistent with flatten: (batch=2, 4, 4, 4) -> 64 features
    x = jax.random.normal(kx, (2, 4, 4, 4), jnp.float32)
    params = init_params(sizes, kp)

    # bf16 inputs/weights vs f32 reference -> loosened tolerance.
    TOL = 2e-2

    # Small-batch (single-invocation) path.
    out = jax.block_until_ready(neural_network_forward(x, params))
    ref = _reference_forward(x, params)
    assert out.shape == (2, sizes[-1])
    assert jnp.allclose(out, ref, atol=TOL), "mismatch vs JAX reference (small B)"

    # Mid batch exercises the tiled path with exactly 2 tiles (v7x: both TCs).
    xb = jax.random.normal(kx2, (256, 4, 4, 4), jnp.float32)
    out_b = jax.block_until_ready(neural_network_forward(xb, params))
    ref_b = _reference_forward(xb, params)
    assert out_b.shape == (256, sizes[-1])
    assert jnp.allclose(out_b, ref_b, atol=TOL), "mismatch vs JAX reference (2-tile B)"

    # Larger, non-multiple batch exercises big tiles + padding slice-off.
    xc = jax.random.normal(kx3, (2050, 4, 4, 4), jnp.float32)
    out_c = jax.block_until_ready(neural_network_forward(xc, params))
    ref_c = _reference_forward(xc, params)
    assert out_c.shape == (2050, sizes[-1])
    assert jnp.allclose(out_c, ref_c, atol=TOL), "mismatch vs JAX reference (large B)"

    print("KERNEL_OK")
</pallas_src>

<mosaic_0001>
module attributes {stable_mosaic.version = 11 : i64} {
  func.func @_fused_mlp_kernel(%arg0: memref<8x64xbf16, #tpu.memory_space<vmem>>, %arg1: memref<64x32xbf16, #tpu.memory_space<vmem>>, %arg2: memref<1x32xf32, #tpu.memory_space<vmem>>, %arg3: memref<32x16xbf16, #tpu.memory_space<vmem>>, %arg4: memref<1x16xf32, #tpu.memory_space<vmem>>, %arg5: memref<16x8xbf16, #tpu.memory_space<vmem>>, %arg6: memref<1x8xf32, #tpu.memory_space<vmem>>, %arg7: memref<8x8xf32, #tpu.memory_space<vmem>>) attributes {dimension_semantics = [], scalar_prefetch = 0 : i64, scratch_operands = 0 : i64, tpu.core_type = #tpu.core_type<tc>} {
    %c0 = arith.constant 0 : index
    %c0_0 = arith.constant 0 : index
    %0 = vector.load %arg0[%c0, %c0_0] : memref<8x64xbf16, #tpu.memory_space<vmem>>, vector<8x64xbf16>
    %c0_1 = arith.constant 0 : index
    %c0_2 = arith.constant 0 : index
    %1 = vector.load %arg1[%c0_1, %c0_2] : memref<64x32xbf16, #tpu.memory_space<vmem>>, vector<64x32xbf16>
    %c0_3 = arith.constant 0 : index
    %c0_4 = arith.constant 0 : index
    %2 = vector.load %arg2[%c0_3, %c0_4] : memref<1x32xf32, #tpu.memory_space<vmem>>, vector<1x32xf32>
    %cst = arith.constant dense<0.000000e+00> : vector<8x32xf32>
    %3 = tpu.matmul %0, %1, %cst {dimension_numbers = #tpu.dot_dimension_numbers<[1], [0], [0], [1], [0, 0, 1, 1], [], []>} : vector<8x64xbf16>, vector<64x32xbf16>, vector<8x32xf32> -> vector<8x32xf32>
    %4 = vector.broadcast %2 : vector<1x32xf32> to vector<8x32xf32>
    %5 = arith.addf %3, %4 : vector<8x32xf32>
    %cst_5 = arith.constant 5.000000e-01 : f32
    %6 = vector.broadcast %cst_5 : f32 to vector<8x32xf32>
    %7 = arith.mulf %6, %5 : vector<8x32xf32>
    %8 = math.tanh %7 : vector<8x32xf32>
    %cst_6 = arith.constant 5.000000e-01 : f32
    %9 = vector.broadcast %cst_6 : f32 to vector<8x32xf32>
    %10 = arith.mulf %9, %8 : vector<8x32xf32>
    %cst_7 = arith.constant 5.000000e-01 : f32
    %11 = vector.broadcast %cst_7 : f32 to vector<8x32xf32>
    %12 = arith.addf %10, %11 : vector<8x32xf32>
    %13 = arith.truncf %12 : vector<8x32xf32> to vector<8x32xbf16>
    %c0_8 = arith.constant 0 : index
    %c0_9 = arith.constant 0 : index
    %14 = vector.load %arg3[%c0_8, %c0_9] : memref<32x16xbf16, #tpu.memory_space<vmem>>, vector<32x16xbf16>
    %c0_10 = arith.constant 0 : index
    %c0_11 = arith.constant 0 : index
    %15 = vector.load %arg4[%c0_10, %c0_11] : memref<1x16xf32, #tpu.memory_space<vmem>>, vector<1x16xf32>
    %cst_12 = arith.constant dense<0.000000e+00> : vector<8x16xf32>
    %16 = tpu.matmul %13, %14, %cst_12 {dimension_numbers = #tpu.dot_dimension_numbers<[1], [0], [0], [1], [0, 0, 1, 1], [], []>} : vector<8x32xbf16>, vector<32x16xbf16>, vector<8x16xf32> -> vector<8x16xf32>
    %17 = vector.broadcast %15 : vector<1x16xf32> to vector<8x16xf32>
    %18 = arith.addf %16, %17 : vector<8x16xf32>
    %cst_13 = arith.constant 5.000000e-01 : f32
    %19 = vector.broadcast %cst_13 : f32 to vector<8x16xf32>
    %20 = arith.mulf %19, %18 : vector<8x16xf32>
    %21 = math.tanh %20 : vector<8x16xf32>
    %cst_14 = arith.constant 5.000000e-01 : f32
    %22 = vector.broadcast %cst_14 : f32 to vector<8x16xf32>
    %23 = arith.mulf %22, %21 : vector<8x16xf32>
    %cst_15 = arith.constant 5.000000e-01 : f32
    %24 = vector.broadcast %cst_15 : f32 to vector<8x16xf32>
    %25 = arith.addf %23, %24 : vector<8x16xf32>
    %26 = arith.truncf %25 : vector<8x16xf32> to vector<8x16xbf16>
    %c0_16 = arith.constant 0 : index
    %c0_17 = arith.constant 0 : index
    %27 = vector.load %arg5[%c0_16, %c0_17] : memref<16x8xbf16, #tpu.memory_space<vmem>>, vector<16x8xbf16>
    %c0_18 = arith.constant 0 : index
    %c0_19 = arith.constant 0 : index
    %28 = vector.load %arg6[%c0_18, %c0_19] : memref<1x8xf32, #tpu.memory_space<vmem>>, vector<1x8xf32>
    %cst_20 = arith.constant dense<0.000000e+00> : vector<8x8xf32>
    %29 = tpu.matmul %26, %27, %cst_20 {dimension_numbers = #tpu.dot_dimension_numbers<[1], [0], [0], [1], [0, 0, 1, 1], [], []>} : vector<8x16xbf16>, vector<16x8xbf16>, vector<8x8xf32> -> vector<8x8xf32>
    %30 = vector.broadcast %28 : vector<1x8xf32> to vector<8x8xf32>
    %31 = arith.addf %29, %30 : vector<8x8xf32>
    %cst_21 = arith.constant 5.000000e-01 : f32
    %32 = vector.broadcast %cst_21 : f32 to vector<8x8xf32>
    %33 = arith.mulf %32, %31 : vector<8x8xf32>
    %34 = math.tanh %33 : vector<8x8xf32>
    %cst_22 = arith.constant 5.000000e-01 : f32
    %35 = vector.broadcast %cst_22 : f32 to vector<8x8xf32>
    %36 = arith.mulf %35, %34 : vector<8x8xf32>
    %c0_23 = arith.constant 0 : index
    %c0_24 = arith.constant 0 : index
    %37 = vector.load %arg7[%c0_23, %c0_24] : memref<8x8xf32, #tpu.memory_space<vmem>>, vector<8x8xf32>
    tpu.vector_store %arg7[%c0_23, %c0_24], %36 {strides = array<i32>} : memref<8x8xf32, #tpu.memory_space<vmem>>, vector<8x8xf32>,
    return
  }
}

</mosaic_0001>

<bundles_post_ra>
// kernel: tpu_custom_call.1
= control target key start
LH: loop header
LB: loop body
LE: loop exit
PB: predicated region body
PF: predicated region fallthrough
CT: control target
= control target key end

     0   :  { %v356_v1 = vmov 0.0   ;;  %vm357_vm0 = vmmov 0   ;;  %s447_s0 = inlined_call_operand.vmem [shape: bf16[8,64], index: 0, kind: input, shape index: {}]   ;;  %s448_s1 = inlined_call_operand.vmem [shape: bf16[64,32], index: 1, kind: input, shape index: {}]   ;;  %s449_s2 = inlined_call_operand.vmem [shape: f32[1,32], index: 2, kind: input, shape index: {}]   ;;  %s450_s3 = inlined_call_operand.vmem [shape: bf16[32,16], index: 3, kind: input, shape index: {}]   ;;  %s451_s4 = inlined_call_operand.vmem [shape: f32[1,16], index: 4, kind: input, shape index: {}]   ;;  %s452_s5 = inlined_call_operand.vmem [shape: bf16[16,8], index: 5, kind: input, shape index: {}]   ;;  %s453_s6 = inlined_call_operand.vmem [shape: f32[1,8], index: 6, kind: input, shape index: {}]   ;;  %s454_s7 = inlined_call_operand.hbm [shape: f32[8,8], index: 7, kind: output, shape index: {}]  }
   0x1   :  { %v319_v0 = vld [vmem:[%s448_s1] sm:$0xff]   ;;  %290 = vmatprep.subr.bf16.mxu0 %v356_v1  ;;  %302 = vmatprep.subr.bf16.mxu1 %v356_v1  ;;  %v320_v2 = vld [vmem:[%s448_s1 + $0x8] sm:$0xff]   ;;  %v321_v3 = vld [vmem:[%s448_s1 + $0x10] sm:$0xff]  }
   0x2   :  { %291 = vmatpush3.bf16.msra.mxu0 %v319_v0  ;;  %298 = vmatprep.mubr.msk.bf16.mxu0 %vm357_vm0, %v356_v1 }
   0x3   :  { %292 = vmatprep.subr.bf16.mxu0 %v356_v1  ;;  %306 = vmatprep.mubr.msk.bf16.mxu1 %vm357_vm0, %v356_v1 }
   0x6   :  { %293 = vmatpush3.bf16.msra.mxu0 %v320_v2 }
   0x7   :  { %12 = vsyncpa [#allocation3], 0  ;;  %294 = vmatprep.subr.bf16.mxu0 %v356_v1  ;;  %v322_v4 = vld [vmem:[%s448_s1 + $0x18] sm:$0xff]   ;;  %v28_v5 = vld [vmem:[%s447_s0] sm:$0xf]  ;;  %vm68_vm1 = vcmask 523264  }
   0x8   :  { %v323_v6 = vld [vmem:[%s450_s3] sm:$0xff]   ;;  %v324_v7 = vld [vmem:[%s450_s3 + $0x8] sm:$0xff]   ;;  %vm140_vm2 = vcmask 261120   ;;  %vm204_vm3 = vcmask 130048   ;;  %vm251_vm4 = vcmask 64512  }
   0x9   :  { %303 = vmatpush3.bf16.msra.mxu1 %v323_v6  ;;  %v267_v8 = vld [vmem:[%s449_s2] ss:$0 sm:$0xff] }
   0xa   :  { %295 = vmatpush3.bf16.msra.mxu0 %v321_v3  ;;  %304 = vmatprep.subr.bf16.mxu1 %v356_v1  ;;  %v325_v19 = vld [vmem:[%s452_s5] sm:$0xff]  }
   0xb   :  { %296 = vmatprep.subr.bf16.mxu0 %v356_v1  ;;  %v273_v20 = vld [vmem:[%s451_s4] ss:$0 sm:$0xff]  ;;  %s358_s4 = smov [#allocation2]  }
   0xc   :  { %v277_v31 = vld [vmem:[%s453_s6] ss:$0 sm:$0xff]  ;;  %s259_s18 = sshll.u32 %s358_s4, 4  ;;  %s260_s18 = int_to_ptr.vmem [resolvable:$true] %s259_s18 }
   0xd   :  { %305 = vmatpush3.bf16.msra.mxu1 %v324_v7  ;;  %s332_s19 = scalar_lea.vmem %s260_s18, 128  ;;  %p337_p1 = scmp.lt.s32.totalorder %s260_s18, %s260_s18 }
   0xe   :  { %297 = vmatpush3.bf16.msra.mxu0 %v322_v4  ;;  %310 = vmatprep.subr.bf16.mxu1 %v356_v1  ;;  %p333_p0 = scmp.ne.s32.totalorder %s260_s18, %s332_s19  ;;  %p338_p2 = scmp.lt.s32.totalorder %s332_s19, %s332_s19 }
  0x10   :  { %p339_p3 = por %p338_p2, %p337_p1 }
  0x11   :  { %299 = vmatmul.mubr.msk.bf16.vlgmr.msra.gmra.mrb[0].mxu0 %vm68_vm1, %v28_v5 }
  0x12   :  { %p340_p4 = pnand %p339_p3, %p333_p0 }
  0xe4   :  { %v106_v9 = vpop.f32.mrb[0].mxu0 }
  0xe5   :  { %v107_v10 = vadd.f32 %v267_v8, %v106_v9  ;;  %v300_v11 = vpop.f32.mrb[1].mxu0 }
  0xe6   :  { %v109_v12 = vpop.f32.mrb[2].mxu0 }
  0xe7   :  { %v112_v13 = vmul.f32 0.5, %v107_v10  ;;  %v301_v14 = vpop.f32.mrb[3].mxu0 }
  0xe9   :  { %326 = vtanh.f32 %v112_v13 }
  0xf3   :  { %v327_v15 = vpop.eup %326 }
  0xf4   :  { %v114_v16 = vmul.f32 0.5, %v327_v15 }
  0xf6   :  { %v115_v17 = vadd.f32 0.5, %v114_v16 }
  0xf8   :  { %v116_v18 = vpack.c.bf16 %v115_v17, %v115_v17 }
  0xfa   :  { %307 = vmatmul.mubr.msk.bf16.vlgmr.msra.gmra.mrb[0].mxu1 %vm140_vm2, %v116_v18 }
  0xfb   :  { %312 = vmatprep.mubr.msk.bf16.mxu1 %vm357_vm0, %v356_v1  ;;  %311 = vmatpush3.bf16.msra.mxu1 %v325_v19 }
 0x1cd   :  { %v178_v21 = vpop.f32.mrb[0].mxu1 }
 0x1ce   :  { %v179_v22 = vadd.f32 %v273_v20, %v178_v21  ;;  %v308_v23 = vpop.f32.mrb[1].mxu1 }
 0x1cf   :  { %v181_v24 = vpop.f32.mrb[2].mxu1 }
 0x1d0   :  { %v184_v25 = vmul.f32 0.5, %v179_v22  ;;  %v309_v26 = vpop.f32.mrb[3].mxu1 }
 0x1d2   :  { %328 = vtanh.f32 %v184_v25 }
 0x1dc   :  { %v329_v27 = vpop.eup %328 }
 0x1dd   :  { %v186_v28 = vmul.f32 0.5, %v329_v27 }
 0x1df   :  { %v187_v29 = vadd.f32 0.5, %v186_v28 }
 0x1e1   :  { %v188_v30 = vpack.c.bf16 %v187_v29, %v187_v29 }
 0x1e3   :  { %313 = vmatmul.mubr.msk.bf16.vlgmr.msra.gmra.mrb[4].mxu1 %vm204_vm3, %v188_v30 }
 0x2b6   :  { %v242_v32 = vpop.f32.mrb[4].mxu1 }
 0x2b7   :  { %v243_v33 = vadd.f32 %v277_v31, %v242_v32  ;;  %v314_v34 = vpop.f32.mrb[5].mxu1 }
 0x2b8   :  { %v245_v35 = vpop.f32.mrb[6].mxu1 }
 0x2b9   :  { %v248_v36 = vmul.f32 0.5, %v243_v33  ;;  %v315_v37 = vpop.f32.mrb[7].mxu1 }
 0x2bb   :  { %330 = vtanh.f32 %v248_v36 }
 0x2c5   :  { %v331_v38 = vpop.eup %330 }
 0x2c6   :  { %v250_v39 = vmul.f32 0.5, %v331_v38 }
 0x2c8   :  { %252 = vst.msk [vmem:[#allocation2] sm:$0xff] %vm251_vm4, %v250_v39 }
 0x2c9   :  { %343 = shalt.err (!%p340_p4)
}
 0x2ca   :  { %s344_s21 = scalar_lea.hbm %s454_s7, 128 }
 0x2cb   :  { %p345_p5 = scmp.ne.s32.totalorder %s454_s7, %s344_s21  ;;  %p348_p6 = scmp.lt.u32.totalorder %s344_s21, %s454_s7 }
 0x2cd   :  { %p350_p7 = pnand %p348_p6, %p345_p5 }
 0x2cf   :  { %353 = shalt.err (!%p350_p7)
}
 0x2d0   :  { %262 = dma.vmem_to_hbm [thread:$0]  %s260_s18, 128, %s454_s7, [#allocation3]  }
 0x2d1   :  { %354 = dma.done.wait [#allocation3], 128  }
 0x2d2   :  { %355 = vsyncadd [#allocation3], 4294967168 }
 0x2d3   :  { %266 = vsyncpa [#allocation3], 1 }

</bundles_post_ra>
